<compile_context>
chip_gen: v7x
topology: tpu7x:2x2x1
jax: 0.10.0
libtpu: 0.0.40
codegen_flags: <defaults>
</compile_context>

<pallas_src>
import jax
import jax.numpy as jnp
from jax.experimental import pallas as pl
from jax.experimental.pallas import tpu as pltpu

FC1_UNITS = 256
FC2_UNITS = 128
SUBLANE = 8     # sublane width: batch/state/action dims padded to multiples of 8
LANE = 128      # lane width: batch tiles are multiples of 128 when grid > 1


def _round_up(x, m):
    return ((x + m - 1) // m) * m


def actor_kernel(x_ref, w1_ref, b1_ref, w2_ref, b2_ref, w3t_ref, b3t_ref, o_ref):
    """Fused 3-layer MLP for one batch tile: relu -> relu -> tanh.

    x_ref:   (TB, S_pad)        bf16  state tile (batch on sublanes)
    w1_ref:  (S_pad, FC1)       bf16
    b1_ref:  (1, FC1)           f32
    w2_ref:  (FC1, FC2)         bf16
    b2_ref:  (1, FC2)           f32
    w3t_ref: (A_sub, FC2)       bf16  fc3 weight in (out, in) layout
    b3t_ref: (A_sub, 1)         f32
    o_ref:   (A_sub, TB)        f32   transposed output: actions on sublanes,
                                      batch on lanes (lane-dense writeback)
    """
    # fc1 + ReLU: f32 MXU accumulation, f32 epilogue, keep only the bf16 copy.
    h1 = jnp.dot(x_ref[...], w1_ref[...], preferred_element_type=jnp.float32)
    h1 = jnp.maximum(h1 + b1_ref[...], 0.0).astype(jnp.bfloat16)

    # fc2 + ReLU
    h2 = jnp.dot(h1, w2_ref[...], preferred_element_type=jnp.float32)
    h2 = jnp.maximum(h2 + b2_ref[...], 0.0).astype(jnp.bfloat16)

    # fc3 + tanh, computed transposed:
    #   (A_sub, FC2) contracted with (TB, FC2) on the last dim -> (A_sub, TB)
    h3t = jax.lax.dot_general(
        w3t_ref[...], h2,
        dimension_numbers=(((1,), (1,)), ((), ())),
        preferred_element_type=jnp.float32)
    o_ref[...] = jnp.tanh(h3t + b3t_ref[...])


def actor_forward(state, params, *, tb=1024):
    """Run the Actor forward pass with a single pallas_call.

    state:  (B, state_size) float32
    params: dict from init_actor_params (bf16 weights, f32 biases, padded).
    Returns (B, action_size) float32.
    """
    w1, b1 = params["w1"], params["b1"]
    w2, b2 = params["w2"], params["b2"]
    w3t, b3t = params["w3t"], params["b3t"]
    action_size = int(params["action_size"])

    B, S = state.shape
    S_pad = w1.shape[0]      # state dim padded to multiple of 8 (zero weight rows)
    A_sub = w3t.shape[0]     # action dim padded to multiple of 8 (zero rows)

    # Batch tile TB and padded batch B_pad:
    #  * grid == 1: TB == B_pad (full-array blocks, any multiple of 8).
    #  * grid >= 2: TB is a multiple of 128 so the transposed output block
    #    (A_sub, TB) keeps a legal lane dimension, and so there are always
    #    >= 2 parallel grid steps for v7x's two TensorCores.
    B_ru = _round_up(max(B, 1), SUBLANE)
    if B_ru < 2 * LANE:
        TB = B_ru
    else:
        TB = min(_round_up(tb, LANE), _round_up(pl.cdiv(B_ru, 2), LANE))
    grid_n = pl.cdiv(B_ru, TB)
    B_pad = grid_n * TB

    # Pad state features (zero rows of w1 make this a numerical no-op), pad the
    # batch to a whole number of tiles, and cast to bf16 to halve input DMA.
    x = state
    if S < S_pad or B_pad > B:
        x = jnp.pad(x, ((0, B_pad - B), (0, S_pad - S)))
    x = x.astype(jnp.bfloat16)

    # Weights/biases stay VMEM-resident for the whole grid: constant index_map
    # plus single buffering (no re-DMA, no wasted double-buffer VMEM).
    def resident(shape):
        return pl.BlockSpec(shape, lambda i: (0, 0), pipeline_mode=pl.Buffered(1))

    out_t = pl.pallas_call(
        actor_kernel,
        out_shape=jax.ShapeDtypeStruct((A_sub, B_pad), jnp.float32),
        grid_spec=pltpu.PrefetchScalarGridSpec(
            num_scalar_prefetch=0,
            grid=(grid_n,),
            in_specs=[
                pl.BlockSpec((TB, S_pad), lambda i: (i, 0)),   # state tile
                resident((S_pad, FC1_UNITS)),                  # w1
                resident((1, FC1_UNITS)),                      # b1
                resident((FC1_UNITS, FC2_UNITS)),              # w2
                resident((1, FC2_UNITS)),                      # b2
                resident((A_sub, FC2_UNITS)),                  # w3 (out, in)
                resident((A_sub, 1)),                          # b3 (out, 1)
            ],
            out_specs=pl.BlockSpec((A_sub, TB), lambda i: (0, i)),
        ),
        compiler_params=pltpu.CompilerParams(
            dimension_semantics=("parallel",),   # v7x: shard batch over 2 TCs
        ),
    )(x, w1, b1, w2, b2, w3t, b3t)

    # (A_sub, B_pad) -> (B, action_size); the slice+transpose touches only the
    # real 16 B/row instead of a 512 B/row padded slab.
    return out_t[:action_size, :B].T


def init_actor_params(key, state_size, action_size,
                      fc1_units=FC1_UNITS, fc2_units=FC2_UNITS):
    """Init mirroring Actor.reset_parameters(), with TPU-friendly padding.

    Layout: w1/w2 are (in, out); w3 is kept in PyTorch (out, in) layout ("w3t")
    because the kernel computes the last layer transposed.  Padding: state dim
    -> multiple of 8 (zero weight rows), action dim -> multiple of 8 (zero
    weight/bias rows).  Weights bf16, biases f32.
    """
    ks = jax.random.split(key, 6)

    def uniform(k, shape, lim):
        return jax.random.uniform(k, shape, jnp.float32, -lim, lim)

    S_pad = _round_up(state_size, SUBLANE)
    A_sub = _round_up(action_size, SUBLANE)

    # fc1: hidden_init uses weight.size()[0] == fc1_units (PyTorch quirk).
    w1 = uniform(ks[0], (state_size, fc1_units), 1.0 / jnp.sqrt(fc1_units))
    w1 = jnp.pad(w1, ((0, S_pad - state_size), (0, 0)))
    b1 = uniform(ks[1], (1, fc1_units), 1.0 / jnp.sqrt(state_size))

    # fc2: lim = 1/sqrt(fc2_units)
    w2 = uniform(ks[2], (fc1_units, fc2_units), 1.0 / jnp.sqrt(fc2_units))
    b2 = uniform(ks[3], (1, fc2_units), 1.0 / jnp.sqrt(fc1_units))

    # fc3: explicit (-3e-3, 3e-3); stored (out, in); zero-pad the out dim.
    w3t = uniform(ks[4], (action_size, fc2_units), 3e-3)
    w3t = jnp.pad(w3t, ((0, A_sub - action_size), (0, 0)))
    b3t = uniform(ks[5], (action_size, 1), 1.0 / jnp.sqrt(fc2_units))
    b3t = jnp.pad(b3t, ((0, A_sub - action_size), (0, 0)))

    return {
        "w1": w1.astype(jnp.bfloat16), "b1": b1,
        "w2": w2.astype(jnp.bfloat16), "b2": b2,
        "w3t": w3t.astype(jnp.bfloat16), "b3t": b3t,
        "action_size": action_size,
    }


def actor_reference(state, p):
    """Pure-JAX reference with identical numerics (bf16 operands, f32 accum)."""
    S_pad = p["w1"].shape[0]
    A = int(p["action_size"])
    x = jnp.pad(state, ((0, 0), (0, S_pad - state.shape[1]))).astype(jnp.bfloat16)
    h1 = jnp.dot(x, p["w1"], preferred_element_type=jnp.float32) + p["b1"]
    h1 = jnp.maximum(h1, 0.0).astype(jnp.bfloat16)
    h2 = jnp.dot(h1, p["w2"], preferred_element_type=jnp.float32) + p["b2"]
    h2 = jnp.maximum(h2, 0.0).astype(jnp.bfloat16)
    h3 = jax.lax.dot_general(h2, p["w3t"],
                             dimension_numbers=(((1,), (1,)), ((), ())),
                             preferred_element_type=jnp.float32)
    return jnp.tanh(h3 + p["b3t"].T)[:, :A]


if __name__ == "__main__":
    key = jax.random.PRNGKey(0)
    k_params, k_state = jax.random.split(key)

    state_size = 16
    action_size = 4
    params = init_actor_params(k_params, state_size, action_size)

    # Small batch: single grid step (full-array blocks).
    state_small = jax.random.normal(k_state, (8, state_size), jnp.float32)
    out_small = jax.block_until_ready(actor_forward(state_small, params))
    ref_small = actor_reference(state_small, params)
    assert out_small.shape == (8, action_size)
    assert jnp.allclose(out_small, ref_small, atol=1e-4, rtol=1e-4), (
        float(jnp.max(jnp.abs(out_small - ref_small))))

    # Larger batch: exercises the multi-step, pipelined / megacore path.
    state_big = jax.random.normal(jax.random.PRNGKey(1), (384, state_size),
                                  jnp.float32)
    out_big = jax.block_until_ready(actor_forward(state_big, params))
    ref_big = actor_reference(state_big, params)
    assert out_big.shape == (384, action_size)
    assert jnp.allclose(out_big, ref_big, atol=1e-4, rtol=1e-4), (
        float(jnp.max(jnp.abs(out_big - ref_big))))

    print("KERNEL_OK")
</pallas_src>

<mosaic_0001>
module attributes {stable_mosaic.version = 11 : i64} {
  func.func @actor_kernel(%arg0: i32, %arg1: memref<8x16xbf16, #tpu.memory_space<vmem>>, %arg2: memref<16x256xbf16, #tpu.memory_space<vmem>>, %arg3: memref<1x256xf32, #tpu.memory_space<vmem>>, %arg4: memref<256x128xbf16, #tpu.memory_space<vmem>>, %arg5: memref<1x128xf32, #tpu.memory_space<vmem>>, %arg6: memref<8x128xbf16, #tpu.memory_space<vmem>>, %arg7: memref<8x1xf32, #tpu.memory_space<vmem>>, %arg8: memref<8x8xf32, #tpu.memory_space<vmem>>) attributes {dimension_semantics = [#tpu.dimension_semantics<parallel>], iteration_bounds = array<i64: 1>, scalar_prefetch = 0 : i64, scratch_operands = 0 : i64, tpu.core_type = #tpu.core_type<tc>, window_params = [{transform_indices = @transform_0, window_bounds = array<i64: 8, 16>}, {pipeline_mode = #tpu.pipeline_mode<synchronous>, transform_indices = @transform_1, window_bounds = array<i64: 16, 256>}, {pipeline_mode = #tpu.pipeline_mode<synchronous>, transform_indices = @transform_2, window_bounds = array<i64: 1, 256>}, {pipeline_mode = #tpu.pipeline_mode<synchronous>, transform_indices = @transform_3, window_bounds = array<i64: 256, 128>}, {pipeline_mode = #tpu.pipeline_mode<synchronous>, transform_indices = @transform_4, window_bounds = array<i64: 1, 128>}, {pipeline_mode = #tpu.pipeline_mode<synchronous>, transform_indices = @transform_5, window_bounds = array<i64: 8, 128>}, {pipeline_mode = #tpu.pipeline_mode<synchronous>, transform_indices = @transform_6, window_bounds = array<i64: 8, 1>}, {transform_indices = @transform_7, window_bounds = array<i64: 8, 8>}]} {
    %c0 = arith.constant 0 : index
    %c0_0 = arith.constant 0 : index
    %0 = vector.load %arg1[%c0, %c0_0] : memref<8x16xbf16, #tpu.memory_space<vmem>>, vector<8x16xbf16>
    %c0_1 = arith.constant 0 : index
    %c0_2 = arith.constant 0 : index
    %1 = vector.load %arg2[%c0_1, %c0_2] : memref<16x256xbf16, #tpu.memory_space<vmem>>, vector<16x256xbf16>
    %cst = arith.constant dense<0.000000e+00> : vector<8x256xf32>
    %2 = tpu.matmul %0, %1, %cst {dimension_numbers = #tpu.dot_dimension_numbers<[1], [0], [0], [1], [0, 0, 1, 1], [], []>} : vector<8x16xbf16>, vector<16x256xbf16>, vector<8x256xf32> -> vector<8x256xf32>
    %c0_3 = arith.constant 0 : index
    %c0_4 = arith.constant 0 : index
    %3 = vector.load %arg3[%c0_3, %c0_4] : memref<1x256xf32, #tpu.memory_space<vmem>>, vector<1x256xf32>
    %4 = vector.broadcast %3 : vector<1x256xf32> to vector<8x256xf32>
    %5 = arith.addf %2, %4 : vector<8x256xf32>
    %cst_5 = arith.constant 0.000000e+00 : f32
    %6 = vector.broadcast %cst_5 : f32 to vector<8x256xf32>
    %7 = arith.maximumf %5, %6 : vector<8x256xf32>
    %8 = arith.truncf %7 : vector<8x256xf32> to vector<8x256xbf16>
    %c0_6 = arith.constant 0 : index
    %c0_7 = arith.constant 0 : index
    %9 = vector.load %arg4[%c0_6, %c0_7] : memref<256x128xbf16, #tpu.memory_space<vmem>>, vector<256x128xbf16>
    %cst_8 = arith.constant dense<0.000000e+00> : vector<8x128xf32>
    %10 = tpu.matmul %8, %9, %cst_8 {dimension_numbers = #tpu.dot_dimension_numbers<[1], [0], [0], [1], [0, 0, 1, 1], [], []>} : vector<8x256xbf16>, vector<256x128xbf16>, vector<8x128xf32> -> vector<8x128xf32>
    %c0_9 = arith.constant 0 : index
    %c0_10 = arith.constant 0 : index
    %11 = vector.load %arg5[%c0_9, %c0_10] : memref<1x128xf32, #tpu.memory_space<vmem>>, vector<1x128xf32>
    %12 = vector.broadcast %11 : vector<1x128xf32> to vector<8x128xf32>
    %13 = arith.addf %10, %12 : vector<8x128xf32>
    %cst_11 = arith.constant 0.000000e+00 : f32
    %14 = vector.broadcast %cst_11 : f32 to vector<8x128xf32>
    %15 = arith.maximumf %13, %14 : vector<8x128xf32>
    %16 = arith.truncf %15 : vector<8x128xf32> to vector<8x128xbf16>
    %c0_12 = arith.constant 0 : index
    %c0_13 = arith.constant 0 : index
    %17 = vector.load %arg6[%c0_12, %c0_13] : memref<8x128xbf16, #tpu.memory_space<vmem>>, vector<8x128xbf16>
    %cst_14 = arith.constant dense<0.000000e+00> : vector<8x8xf32>
    %18 = tpu.matmul %17, %16, %cst_14 {dimension_numbers = #tpu.dot_dimension_numbers<[1], [1], [0], [0], [0, 0, 1, 0], [], []>} : vector<8x128xbf16>, vector<8x128xbf16>, vector<8x8xf32> -> vector<8x8xf32>
    %c0_15 = arith.constant 0 : index
    %c0_16 = arith.constant 0 : index
    %19 = vector.load %arg7[%c0_15, %c0_16] : memref<8x1xf32, #tpu.memory_space<vmem>>, vector<8x1xf32>
    %20 = vector.broadcast %19 : vector<8x1xf32> to vector<8x8xf32>
    %21 = arith.addf %18, %20 : vector<8x8xf32>
    %22 = math.tanh %21 : vector<8x8xf32>
    %c0_17 = arith.constant 0 : index
    %c0_18 = arith.constant 0 : index
    %23 = vector.load %arg8[%c0_17, %c0_18] : memref<8x8xf32, #tpu.memory_space<vmem>>, vector<8x8xf32>
    tpu.vector_store %arg8[%c0_17, %c0_18], %22 {strides = array<i32>} : memref<8x8xf32, #tpu.memory_space<vmem>>, vector<8x8xf32>,
    return
  }
  func.func @transform_0(%arg0: i32) -> (i32, i32) {
    %c0_i32 = arith.constant 0 : i32
    %c0_i32_0 = arith.constant 0 : i32
    return %arg0, %c0_i32 : i32, i32
  }
  func.func @transform_1(%arg0: i32) -> (i32, i32) {
    %c0_i32 = arith.constant 0 : i32
    %c0_i32_0 = arith.constant 0 : i32
    %c0_i32_1 = arith.constant 0 : i32
    return %c0_i32, %c0_i32_0 : i32, i32
  }
  func.func @transform_2(%arg0: i32) -> (i32, i32) {
    %c0_i32 = arith.constant 0 : i32
    %c0_i32_0 = arith.constant 0 : i32
    %c0_i32_1 = arith.constant 0 : i32
    return %c0_i32, %c0_i32_0 : i32, i32
  }
  func.func @transform_3(%arg0: i32) -> (i32, i32) {
    %c0_i32 = arith.constant 0 : i32
    %c0_i32_0 = arith.constant 0 : i32
    %c0_i32_1 = arith.constant 0 : i32
    return %c0_i32, %c0_i32_0 : i32, i32
  }
  func.func @transform_4(%arg0: i32) -> (i32, i32) {
    %c0_i32 = arith.constant 0 : i32
    %c0_i32_0 = arith.constant 0 : i32
    %c0_i32_1 = arith.constant 0 : i32
    return %c0_i32, %c0_i32_0 : i32, i32
  }
  func.func @transform_5(%arg0: i32) -> (i32, i32) {
    %c0_i32 = arith.constant 0 : i32
    %c0_i32_0 = arith.constant 0 : i32
    %c0_i32_1 = arith.constant 0 : i32
    return %c0_i32, %c0_i32_0 : i32, i32
  }
  func.func @transform_6(%arg0: i32) -> (i32, i32) {
    %c0_i32 = arith.constant 0 : i32
    %c0_i32_0 = arith.constant 0 : i32
    %c0_i32_1 = arith.constant 0 : i32
    return %c0_i32, %c0_i32_0 : i32, i32
  }
  func.func @transform_7(%arg0: i32) -> (i32, i32) {
    %c0_i32 = arith.constant 0 : i32
    %c0_i32_0 = arith.constant 0 : i32
    return %c0_i32, %arg0 : i32, i32
  }
}

</mosaic_0001>

<bundles_post_ra>
// kernel: tpu_custom_call.1
= control target key start
LH: loop header
LB: loop body
LE: loop exit
PB: predicated region body
PF: predicated region fallthrough
CT: control target
= control target key end

     0   :  { %12 = vsyncpa [#allocation3], 0  ;;  %s628_s0 = inlined_call_operand.vmem [shape: bf16[8,16], index: 0, kind: input, shape index: {}]   ;;  %s629_s1 = inlined_call_operand.hbm [shape: bf16[16,256], index: 1, kind: input, shape index: {}]   ;;  %s630_s2 = inlined_call_operand.vmem [shape: f32[1,256], index: 2, kind: input, shape index: {}]   ;;  %s631_s3 = inlined_call_operand.hbm [shape: bf16[256,128], index: 3, kind: input, shape index: {}]   ;;  %s632_s4 = inlined_call_operand.vmem [shape: f32[1,128], index: 4, kind: input, shape index: {}]   ;;  %s633_s5 = inlined_call_operand.vmem [shape: bf16[8,128], index: 5, kind: input, shape index: {}]   ;;  %s634_s6 = inlined_call_operand.vmem [shape: f32[8,1], index: 6, kind: input, shape index: {}]   ;;  %s635_s7 = inlined_call_operand.hbm [shape: f32[8,8], index: 7, kind: output, shape index: {}]  }
   0x1   :  { %13 = vsyncpa [#allocation6], 0 }
   0x2   :  { %14 = vsyncpa [#allocation4], 0  ;;  %s527_s24 = smov [#allocation2]   ;;  %s455_s28 = scalar_lea.hbm %s629_s1, 256 }
   0x3   :  { %s22_s25 = sshll.u32 %s527_s24, 4  ;;  %p456_p0 = scmp.ne.s32.totalorder %s629_s1, %s455_s28  ;;  %s23_s25 = int_to_ptr.vmem [resolvable:$true] %s22_s25 }
   0x4   :  { %p459_p1 = scmp.lt.u32.totalorder %s455_s28, %s629_s1 }
   0x6   :  { %p461_p2 = pnand %p459_p1, %p456_p0 }
   0x8   :  { %464 = shalt.err (!%p461_p2)
}
   0x9   :  { %s465_s10 = scalar_lea.vmem %s23_s25, 256  ;;  %p470_p4 = scmp.lt.s32.totalorder %s23_s25, %s23_s25 }
   0xa   :  { %p466_p3 = scmp.ne.s32.totalorder %s23_s25, %s465_s10  ;;  %p471_p5 = scmp.lt.s32.totalorder %s465_s10, %s465_s10 }
   0xc   :  { %p472_p6 = por %p471_p5, %p470_p4 }
   0xe   :  { %p473_p7 = pnand %p472_p6, %p466_p3 }
  0x10   :  { %476 = shalt.err (!%p473_p7)
}
  0x11   :  { %s528_s11 = smov 128   ;;  %s529_s12 = smov 8  }
  0x12   :  { %28 = dma.hbm_to_vmem [thread:$0]  %s629_s1, 256, %s23_s25, [#allocation3], %s528_s11, %s528_s11, %s529_s12  }
  0x13   :  { %s530_s15 = smov [#allocation5]   ;;  %s477_s19 = scalar_lea.hbm %s631_s3, 2048 }
  0x14   :  { %s36_s16 = sshll.u32 %s530_s15, 4  ;;  %p478_p8 = scmp.ne.s32.totalorder %s631_s3, %s477_s19  ;;  %s37_s16 = int_to_ptr.vmem [resolvable:$true] %s36_s16 }
  0x15   :  { %p481_p9 = scmp.lt.u32.totalorder %s477_s19, %s631_s3 }
  0x17   :  { %p483_p10 = pnand %p481_p9, %p478_p8 }
  0x19   :  { %486 = shalt.err (!%p483_p10)
}
  0x1a   :  { %s487_s24 = scalar_lea.vmem %s37_s16, 2048  ;;  %p492_p12 = scmp.lt.s32.totalorder %s37_s16, %s37_s16 }
  0x1b   :  { %p488_p11 = scmp.ne.s32.totalorder %s37_s16, %s487_s24  ;;  %p493_p13 = scmp.lt.s32.totalorder %s487_s24, %s487_s24 }
  0x1d   :  { %p494_p0 = por %p493_p13, %p492_p12 }
  0x1f   :  { %p495_p1 = pnand %p494_p0, %p488_p11 }
  0x21   :  { %498 = shalt.err (!%p495_p1)
}
  0x22   :  { %s531_s1 = smov 64   ;;  %s532_s25 = smov 4  }
  0x23   :  { %42 = dma.hbm_to_vmem [thread:$0]  %s631_s3, 2048, %s37_s16, [#allocation6], %s531_s1, %s531_s1, %s532_s25  }
  0x24   :  { %521 = dma.done.wait [#allocation3], 256  }
  0x25   :  { %522 = vsyncadd [#allocation3], 4294967040 }
  0x26   :  { %523 = dma.done.wait [#allocation6], 2048  }
  0x27   :  { %524 = vsyncadd [#allocation6], 4294965248  ;;  %v533_v0 = vmov 0   ;;  %v434_v1 = vld [vmem:[#allocation2 + $0x4] ss:$8 sps:$4 sm:$0xff]   ;;  %v437_v4 = vld [vmem:[#allocation5 + $0x40] sm:$0xff]   ;;  %v61_v20 = vlaneseq }
  0x28   :  { %117 = vmatprep.mubr.bf16.mxu0 %v533_v0  ;;  %433 = vset.pattern.permute.xlu0 %v533_v0  ;;  %v436_v2 = vld [vmem:[#allocation2] ss:$8 sps:$4 sm:$0xff]   ;;  %vm81_vm0 = vcmask 130048   ;;  %v438_v5 = vld [vmem:[#allocation5] sm:$0xff]   ;;  %v439_v6 = vld [vmem:[#allocation5 + $0x48] sm:$0xff]   ;;  %v534_v37 = vmov 0.0  }
  0x29   :  { %v56_v3 = vld [vmem:[%s628_s0] sm:$0xf]  ;;  %85 = vmatprep.subr.bf16.mxu0 %v434_v1  ;;  %393 = vmatprep.subr.bf16.mxu1 %v437_v4  ;;  %v440_v7 = vld [vmem:[#allocation5 + $0x8] sm:$0xff]   ;;  %v443_v10 = vld [vmem:[#allocation5 + $0x58] sm:$0xff]   ;;  %v62_v21 = vshrl.u32 %v61_v20, 7  ;;  %vm535_vm1 = vmmov 0  }
  0x2a   :  { %86 = vmatpush1.bf16.msra.mxu0 %v436_v2  ;;  %394 = vmatpush3.bf16.msra.mxu1 %v438_v5  ;;  %v441_v8 = vld [vmem:[#allocation5 + $0x50] sm:$0xff]   ;;  %v444_v11 = vld [vmem:[#allocation5 + $0x18] sm:$0xff]   ;;  %v445_v12 = vld [vmem:[#allocation5 + $0x60] sm:$0xff]   ;;  %vm355_vm2 = vcmask 64512  }
  0x2b   :  { %395 = vmatprep.subr.bf16.mxu1 %v439_v6  ;;  %v442_v9 = vld [vmem:[#allocation5 + $0x10] sm:$0xff]   ;;  %v446_v13 = vld [vmem:[#allocation5 + $0x20] sm:$0xff]   ;;  %v447_v14 = vld [vmem:[#allocation5 + $0x68] sm:$0xff]   ;;  %v63_v22 = vsub.s32 0, %v62_v21  ;;  %v67_v24 = vsub.s32 1, %v62_v21  ;;  %417 = vmatprep.subr.bf16.mxu0 %v534_v37 }
  0x2c   :  { %v448_v15 = vld [vmem:[#allocation5 + $0x28] sm:$0xff]   ;;  %v449_v16 = vld [vmem:[#allocation5 + $0x70] sm:$0xff]   ;;  %v451_v18 = vld [vmem:[#allocation5 + $0x78] sm:$0xff]  }
  0x2d   :  { %375 = vmatmul.mubr.msk.bf16.vlgmr.msra.gmra.mrb[0].mxu0 %vm81_vm0, %v56_v3  ;;  %v450_v17 = vld [vmem:[#allocation5 + $0x30] sm:$0xff]   ;;  %v452_v19 = vld [vmem:[#allocation5 + $0x38] sm:$0xff]  }
  0x2e   :  { %396 = vmatpush3.bf16.msra.mxu1 %v440_v7  ;;  %v59_v23 = vld [vmem:[%s630_s2] sm:$0x3]  ;;  %419 = vmatprep.mubr.msk.bf16.mxu0 %vm535_vm1, %v534_v37 }
  0x2f   :  { %397 = vmatprep.subr.bf16.mxu1 %v441_v8  ;;  %v64_v25 = vrot.slane %v59_v23, %v63_v22  ;;  %v68_v26 = vrot.slane %v59_v23, %v67_v24  ;;  %v308_v38 = vld [vmem:[%s634_s6] sm:$0xff] }
  0x30   :  { %311 = vperm.xlu0 %433, %v308_v38   ;;  %v376_v40 = vld [vmem:[%s632_s4] ss:$0 sm:$0xff]  ;;  %s536_s4 = smov [#allocation7]  }
  0x31   :  { %v307_v48 = vld [vmem:[%s633_s5] sm:$0xf]  ;;  %s363_s6 = sshll.u32 %s536_s4, 4  ;;  %s364_s6 = int_to_ptr.vmem [resolvable:$true] %s363_s6 }
  0x32   :  { %398 = vmatpush3.bf16.msra.mxu1 %v442_v9  ;;  %s499_s12 = scalar_lea.vmem %s364_s6, 128  ;;  %p504_p3 = scmp.lt.s32.totalorder %s364_s6, %s364_s6 }
  0x33   :  { %399 = vmatprep.subr.bf16.mxu1 %v443_v10  ;;  %p500_p2 = scmp.ne.s32.totalorder %s364_s6, %s499_s12  ;;  %p505_p4 = scmp.lt.s32.totalorder %s499_s12, %s499_s12 }
  0x35   :  { %p506_p5 = por %p505_p4, %p504_p3 }
  0x36   :  { %400 = vmatpush3.bf16.msra.mxu1 %v444_v11 }
  0x37   :  { %401 = vmatprep.subr.bf16.mxu1 %v445_v12  ;;  %p507_p6 = pnand %p506_p5, %p500_p2 }
  0x3a   :  { %402 = vmatpush3.bf16.msra.mxu1 %v446_v13 }
  0x3b   :  { %403 = vmatprep.subr.bf16.mxu1 %v447_v14 }
  0x3e   :  { %404 = vmatpush3.bf16.msra.mxu1 %v448_v15 }
  0x3f   :  { %405 = vmatprep.subr.bf16.mxu1 %v449_v16 }
  0x42   :  { %406 = vmatpush3.bf16.msra.mxu1 %v450_v17 }
  0x43   :  { %407 = vmatprep.subr.bf16.mxu1 %v451_v18 }
  0x46   :  { %408 = vmatpush3.bf16.msra.mxu1 %v452_v19 }
  0xaf   :  { %v312_v49 = vpop.permute.xlu0 %311 }
 0x100   :  { %v119_v27 = vpop.f32.mrb[0].mxu0 }
 0x101   :  { %v120_v28 = vadd.f32 %v119_v27, %v64_v25  ;;  %v121_v29 = vpop.f32.mrb[1].mxu0 }
 0x102   :  { %v122_v30 = vadd.f32 %v121_v29, %v68_v26  ;;  %v123_v31 = vpop.f32.mrb[2].mxu0 }
 0x103   :  { %v126_v32 = vmax.f32 %v120_v28, 0.0  ;;  %v124_v33 = vpop.f32.mrb[3].mxu0 }
 0x104   :  { %v127_v34 = vmax.f32 %v122_v30, 0.0 }
 0x105   :  { %v128_v36 = vpack.c.bf16 %v126_v32, %v126_v32 }
 0x106   :  { %v129_v35 = vpack.c.bf16 %v127_v34, %v127_v34 }
 0x108   :  { %297 = vmatprep.mubr.bf16.mxu1 %v129_v35 }
 0x109   :  { %298 = vmatmul.mubr.bf16.vlgmr.msra.gmra.mrb[0].mxu1 %v128_v36 }
 0x1dc   :  { %v409_v39 = vpop.f32.mrb[0].mxu1 }
 0x1dd   :  { %v410_v41 = vpop.f32.mrb[1].mxu1 }
 0x1de   :  { %v411_v42 = vadd.f32 %v410_v41, %v409_v39  ;;  %v412_v43 = vpop.f32.mrb[2].mxu1 }
 0x1df   :  { %v413_v44 = vpop.f32.mrb[3].mxu1 }
 0x1e0   :  { %v300_v45 = vadd.f32 %v411_v42, %v376_v40 }
 0x1e2   :  { %v305_v46 = vmax.f32 %v300_v45, 0.0 }
 0x1e4   :  { %v306_v47 = vpack.c.bf16 %v305_v46, %v305_v46 }
 0x1e6   :  { %418 = vmatpush3.bf16.xpose.msra.mxu0 %v306_v47 }
 0x1ed   :  { %420 = vmatmul.mubr.bf16.vlgmr.msra.gmra.mrb[4].mxu0 %v307_v48 }
 0x2c0   :  { %v348_v50 = vpop.f32.mrb[4].mxu0 }
 0x2c1   :  { %v349_v51 = vadd.f32 %v348_v50, %v312_v49  ;;  %v421_v52 = vpop.f32.mrb[5].mxu0 }
 0x2c2   :  { %v351_v53 = vpop.f32.mrb[6].mxu0 }
 0x2c3   :  { %453 = vtanh.f32 %v349_v51  ;;  %v422_v54 = vpop.f32.mrb[7].mxu0 }
 0x2cd   :  { %v454_v55 = vpop.eup %453 }
 0x2ce   :  { %356 = vst.msk [vmem:[#allocation7] sm:$0xff] %vm355_vm2, %v454_v55 }
 0x2cf   :  { %510 = shalt.err (!%p507_p6)
}
 0x2d0   :  { %s511_s14 = scalar_lea.hbm %s635_s7, 128 }
 0x2d1   :  { %p512_p7 = scmp.ne.s32.totalorder %s635_s7, %s511_s14  ;;  %p515_p8 = scmp.lt.u32.totalorder %s511_s14, %s635_s7 }
 0x2d3   :  { %p517_p9 = pnand %p515_p8, %p512_p7 }
 0x2d5   :  { %520 = shalt.err (!%p517_p9)
}
 0x2d6   :  { %366 = dma.vmem_to_hbm [thread:$0]  %s364_s6, 128, %s635_s7, [#allocation4]  }
 0x2d7   :  { %525 = dma.done.wait [#allocation4], 128  }
 0x2d8   :  { %526 = vsyncadd [#allocation4], 4294967168 }
 0x2d9   :  { %370 = vsyncpa [#allocation3], 1 }
 0x2da   :  { %371 = vsyncpa [#allocation6], 1 }
 0x2db   :  { %372 = vsyncpa [#allocation4], 1 }

</bundles_post_ra>
